<compile_context>
chip_gen: v5e
topology: v5e:2x2
jax: 0.10.0
libtpu: 0.0.40
codegen_flags: <defaults>
</compile_context>

<pallas_src>
import jax
import jax.numpy as jnp
from jax.experimental import pallas as pl
from jax.experimental.pallas import tpu as pltpu


def _round_up(x, m):
    return (x + m - 1) // m * m


def _probe_buffered():
    if not hasattr(pl, "Buffered"):
        return False
    try:
        pl.BlockSpec((8, 128), lambda i: (0, 0), pipeline_mode=pl.Buffered(1))
        return True
    except Exception:
        return False


_BUFFERED_OK = _probe_buffered()


def _vmem_capacity_bytes():
    try:
        return int(pltpu.get_tpu_info().vmem_capacity_bytes)
    except Exception:
        return 64 * 1024 * 1024  # conservative default (v7x per-core VMEM)


# ----------------------------- kernels --------------------------------------


def _resident_w6_kernel(x_ref, w6_ref, b6_ref, w7_ref, b7_ref, o_ref):
    # fc6: cast the f32 x tile to bf16 just before the MXU dot (VPU slot is free
    # here -- the kernel is MXU/DMA bound); accumulate in f32.
    h = jnp.dot(x_ref[...].astype(w6_ref.dtype), w6_ref[...],
                preferred_element_type=jnp.float32)
    h = jnp.maximum(h + b6_ref[...], 0.0)
    # fc7 (+bias) + ReLU fused: the hidden activation never touches HBM.
    o = jnp.dot(h.astype(w7_ref.dtype), w7_ref[...],
                preferred_element_type=jnp.float32)
    o_ref[...] = jnp.maximum(o + b7_ref[...], 0.0).astype(o_ref.dtype)


def _ktiled_kernel(x_ref, w6_ref, b6_ref, w7_ref, b7_ref, o_ref, acc_ref):
    k = pl.program_id(1)

    # Init accumulator with the fc6 bias (saves one (TM,R) VPU add later).
    @pl.when(k == 0)
    def _():
        acc_ref[...] = jnp.broadcast_to(b6_ref[...], acc_ref.shape)

    # fc6 partial product for this K slab: bf16 MXU operands, f32 accumulate.
    acc_ref[...] += jnp.dot(x_ref[...].astype(w6_ref.dtype), w6_ref[...],
                            preferred_element_type=jnp.float32)

    # Epilogue: ReLU -> fc7 (+bias) -> ReLU -> store, once per batch tile.
    @pl.when(k == pl.num_programs(1) - 1)
    def _():
        h = jnp.maximum(acc_ref[...], 0.0)
        o = jnp.dot(h.astype(w7_ref.dtype), w7_ref[...],
                    preferred_element_type=jnp.float32)
        o_ref[...] = jnp.maximum(o + b7_ref[...], 0.0).astype(o_ref.dtype)


# --------------------------- weight preparation ------------------------------


def _pick_tk(k_in, tk_default):
    """K tile for the K-tiled path. Prefer a divisor of the 128-padded K (no
    extra zero padding); otherwise accept padding to keep tiles large."""
    kp0 = _round_up(k_in, 128)
    cap = max(128, min(_round_up(tk_default, 128), kp0))
    t = cap
    while t >= 128:
        if kp0 % t == 0:
            break
        t -= 128
    if t >= cap // 2:
        return t, kp0
    return cap, _round_up(kp0, cap)


def prepare_two_mlp_head_params(w6, b6, w7, b7, *, tk=2048):
    """One-time weight prep (do NOT run per forward): bf16 cast + K padding.

    w6: (in_features, representation_size)   -- transposed vs torch Linear.weight
    w7: (representation_size, representation_size)
    """
    k_in, r = w6.shape
    assert w7.shape == (r, r) and b6.shape == (r,) and b7.shape == (r,)
    tk_eff, kp = _pick_tk(k_in, tk)
    w6_bf = w6.astype(jnp.bfloat16)
    if kp != k_in:
        w6_bf = jnp.pad(w6_bf, ((0, kp - k_in), (0, 0)))
    return {
        "w6": w6_bf,                                  # (kp, r) bf16, K-padded
        "w7": w7.astype(jnp.bfloat16),                # (r, r)  bf16
        "b6": b6.reshape(1, r).astype(jnp.float32),   # (1, r)  f32
        "b7": b7.reshape(1, r).astype(jnp.float32),   # (1, r)  f32
        "k_in": int(k_in),
        "kp": int(kp),
        "r": int(r),
        "tk": int(tk_eff),
    }


# ------------------------------ forward --------------------------------------


def two_mlp_head_apply(x_nchw, params, *, tm=256):
    """Forward pass of TwoMLPHead with pre-prepared weights. Returns (N, R)."""
    n = x_nchw.shape[0]
    k_in = 1
    for d in x_nchw.shape[1:]:
        k_in *= d
    assert k_in == params["k_in"], "input feature size mismatch with prepared weights"
    kp, r, tk_eff = params["kp"], params["r"], params["tk"]
    out_dtype = x_nchw.dtype
    out_itemsize = jnp.dtype(out_dtype).itemsize

    # flatten(start_dim=1) -- glue, stays in plain JAX.
    x_flat = x_nchw.reshape(n, k_in)

    # Batch tile: 256 fills the 256-wide MXU on v6e/v7x; clamped for small N.
    tm_eff = tm if n >= tm else _round_up(n, 8)
    np_ = _round_up(n, tm_eff)

    # Zero-pad batch / K (zeros are neutral for x @ w6; padded rows sliced off).
    if (np_, kp) != (n, k_in):
        x_flat = jnp.pad(x_flat, ((0, np_ - n), (0, kp - k_in)))

    vmem_budget = int(0.75 * _vmem_capacity_bytes())  # headroom for compiler scratch

    res_bufs = 1 if _BUFFERED_OK else 2
    need_resident = (res_bufs * (kp * r * 2 + r * r * 2 + 2 * r * 4)
                     + 2 * tm_eff * kp * 4               # x tiles (f32, 2 bufs)
                     + 2 * tm_eff * r * out_itemsize)    # output tiles (2 bufs)
    use_resident_w6 = need_resident <= int(0.9 * vmem_budget)

    def run(single_buffer_residents):
        rb = 1 if single_buffer_residents else 2

        def res_spec(shape):
            if single_buffer_residents:
                return pl.BlockSpec(shape, lambda *_: (0, 0),
                                    pipeline_mode=pl.Buffered(1))
            return pl.BlockSpec(shape, lambda *_: (0, 0))

        if use_resident_w6:
            # Batch-only grid: w6 is DMA'd from HBM exactly once per core.
            grid = (np_ // tm_eff,)
            in_specs = [
                pl.BlockSpec((tm_eff, kp), lambda i: (i, 0)),   # x (streamed, f32)
                res_spec((kp, r)),                              # w6 (resident)
                res_spec((1, r)),                               # b6 (resident)
                res_spec((r, r)),                               # w7 (resident)
                res_spec((1, r)),                               # b7 (resident)
            ]
            out_specs = pl.BlockSpec((tm_eff, r), lambda i: (i, 0))
            scratch = []
            kernel = _resident_w6_kernel
            dims = ("parallel",)
            need = (rb * (kp * r * 2 + r * r * 2 + 2 * r * 4)
                    + 2 * tm_eff * kp * 4 + 2 * tm_eff * r * out_itemsize)
            w6_reads = 1
        else:
            # K-tiled reduction grid with a resident f32 accumulator.
            grid = (np_ // tm_eff, kp // tk_eff)
            in_specs = [
                pl.BlockSpec((tm_eff, tk_eff), lambda i, k: (i, k)),  # x (streamed)
                pl.BlockSpec((tk_eff, r), lambda i, k: (k, 0)),       # w6 (streamed)
                res_spec((1, r)),                                     # b6 (resident)
                res_spec((r, r)),                                     # w7 (resident)
                res_spec((1, r)),                                     # b7 (resident)
            ]
            out_specs = pl.BlockSpec((tm_eff, r), lambda i, k: (i, 0))
            scratch = [pltpu.VMEM((tm_eff, r), jnp.float32)]
            kernel = _ktiled_kernel
            dims = ("parallel", "arbitrary")
            need = (2 * (tm_eff * tk_eff * 4 + tk_eff * r * 2)
                    + rb * (r * r * 2 + 2 * r * 4)
                    + tm_eff * r * 4 + 2 * tm_eff * r * out_itemsize)
            w6_reads = np_ // tm_eff

        vmem_limit = int(min(max(2 * need, 16 * 1024 * 1024), vmem_budget))

        cost = pl.CostEstimate(
            flops=2 * np_ * kp * r + 2 * np_ * r * r,
            transcendentals=0,
            bytes_accessed=int(
                np_ * kp * 4                     # x (f32), read once
                + w6_reads * kp * r * 2          # w6, re-read per batch tile
                + r * r * 2 + 2 * r * 4          # w7 + biases
                + np_ * r * out_itemsize         # output
            ),
        )

        return pl.pallas_call(
            kernel,
            out_shape=jax.ShapeDtypeStruct((np_, r), out_dtype),
            grid_spec=pltpu.PrefetchScalarGridSpec(
                num_scalar_prefetch=0,
                grid=grid,
                in_specs=in_specs,
                out_specs=out_specs,
                scratch_shapes=scratch,
            ),
            compiler_params=pltpu.CompilerParams(
                dimension_semantics=dims,
                vmem_limit_bytes=vmem_limit,
            ),
            cost_estimate=cost,
        )(x_flat, params["w6"], params["b6"], params["w7"], params["b7"])

    try:
        out = run(_BUFFERED_OK)
    except Exception:
        if not _BUFFERED_OK:
            raise
        out = run(False)   # retry with default double-buffered residents

    return out[:n]


def two_mlp_head(x_nchw, w6, b6, w7, b7, *, tm=256, tk=2048):
    """One-shot convenience wrapper; for repeated calls prepare params once."""
    return two_mlp_head_apply(
        x_nchw, prepare_two_mlp_head_params(w6, b6, w7, b7, tk=tk), tm=tm)


# ------------------------------ references -----------------------------------


def _reference_bf16(x_nchw, w6, b6, w7, b7):
    """Mirrors the kernel's mixed precision (bf16 matmul inputs, f32 accum)."""
    x = x_nchw.reshape(x_nchw.shape[0], -1).astype(jnp.bfloat16)
    h = jnp.dot(x, w6.astype(jnp.bfloat16), preferred_element_type=jnp.float32) + b6
    h = jnp.maximum(h, 0.0)
    o = jnp.dot(h.astype(jnp.bfloat16), w7.astype(jnp.bfloat16),
                preferred_element_type=jnp.float32) + b7
    return jnp.maximum(o, 0.0)


def _reference_f32(x_nchw, w6, b6, w7, b7):
    x = x_nchw.reshape(x_nchw.shape[0], -1)
    h = jnp.maximum(x @ w6 + b6, 0.0)
    return jnp.maximum(h @ w7 + b7, 0.0)


if __name__ == "__main__":
    # Small shapes consistent with the module's forward:
    # batch=8, channels=4, spatial=4x4 -> in_channels=64, representation=128.
    N, C, H, W = 8, 4, 4, 4
    in_channels = C * H * W            # 64
    representation_size = 128

    key = jax.random.PRNGKey(0)
    kx, k6w, k6b, k7w, k7b = jax.random.split(key, 5)

    x = jax.random.normal(kx, (N, C, H, W), dtype=jnp.float32)

    # Deterministic synthetic params (mimics torch Linear uniform init bound).
    bound6 = 1.0 / (in_channels ** 0.5)
    bound7 = 1.0 / (representation_size ** 0.5)
    w6 = jax.random.uniform(k6w, (in_channels, representation_size),
                            minval=-bound6, maxval=bound6, dtype=jnp.float32)
    b6 = jax.random.uniform(k6b, (representation_size,),
                            minval=-bound6, maxval=bound6, dtype=jnp.float32)
    w7 = jax.random.uniform(k7w, (representation_size, representation_size),
                            minval=-bound7, maxval=bound7, dtype=jnp.float32)
    b7 = jax.random.uniform(k7b, (representation_size,),
                            minval=-bound7, maxval=bound7, dtype=jnp.float32)

    # One-time weight preparation, then forward.
    params = prepare_two_mlp_head_params(w6, b6, w7, b7)
    out = two_mlp_head_apply(x, params)
    out = jax.block_until_ready(out)
    assert out.shape == (N, representation_size)

    # Check against a reference with matching mixed precision.
    ref_bf = _reference_bf16(x, w6, b6, w7, b7)
    assert jnp.allclose(out, ref_bf, atol=2e-3, rtol=2e-3), "mismatch vs bf16 reference"

    # Loose check against the full-f32 PyTorch-equivalent reference.
    ref_f32 = _reference_f32(x, w6, b6, w7, b7)
    assert jnp.allclose(out, ref_f32, atol=1e-1, rtol=1e-1), "mismatch vs f32 reference"

    print("KERNEL_OK")
</pallas_src>

<mosaic_0001>
module attributes {stable_mosaic.version = 11 : i64} {
  func.func @_resident_w6_kernel(%arg0: i32, %arg1: memref<8x128xf32, #tpu.memory_space<vmem>>, %arg2: memref<128x128xbf16, #tpu.memory_space<vmem>>, %arg3: memref<1x128xf32, #tpu.memory_space<vmem>>, %arg4: memref<128x128xbf16, #tpu.memory_space<vmem>>, %arg5: memref<1x128xf32, #tpu.memory_space<vmem>>, %arg6: memref<8x128xf32, #tpu.memory_space<vmem>>) attributes {dimension_semantics = [#tpu.dimension_semantics<parallel>], iteration_bounds = array<i64: 1>, scalar_prefetch = 0 : i64, scratch_operands = 0 : i64, tpu.core_type = #tpu.core_type<tc>, window_params = [{transform_indices = @transform_0, window_bounds = array<i64: 8, 128>}, {pipeline_mode = #tpu.pipeline_mode<synchronous>, transform_indices = @transform_1, window_bounds = array<i64: 128, 128>}, {pipeline_mode = #tpu.pipeline_mode<synchronous>, transform_indices = @transform_2, window_bounds = array<i64: 1, 128>}, {pipeline_mode = #tpu.pipeline_mode<synchronous>, transform_indices = @transform_3, window_bounds = array<i64: 128, 128>}, {pipeline_mode = #tpu.pipeline_mode<synchronous>, transform_indices = @transform_4, window_bounds = array<i64: 1, 128>}, {transform_indices = @transform_5, window_bounds = array<i64: 8, 128>}]} {
    %c0 = arith.constant 0 : index
    %c0_0 = arith.constant 0 : index
    %0 = vector.load %arg1[%c0, %c0_0] : memref<8x128xf32, #tpu.memory_space<vmem>>, vector<8x128xf32>
    %1 = arith.truncf %0 : vector<8x128xf32> to vector<8x128xbf16>
    %c0_1 = arith.constant 0 : index
    %c0_2 = arith.constant 0 : index
    %2 = vector.load %arg2[%c0_1, %c0_2] : memref<128x128xbf16, #tpu.memory_space<vmem>>, vector<128x128xbf16>
    %cst = arith.constant dense<0.000000e+00> : vector<8x128xf32>
    %3 = tpu.matmul %1, %2, %cst {dimension_numbers = #tpu.dot_dimension_numbers<[1], [0], [0], [1], [0, 0, 1, 1], [], []>} : vector<8x128xbf16>, vector<128x128xbf16>, vector<8x128xf32> -> vector<8x128xf32>
    %c0_3 = arith.constant 0 : index
    %c0_4 = arith.constant 0 : index
    %4 = vector.load %arg3[%c0_3, %c0_4] : memref<1x128xf32, #tpu.memory_space<vmem>>, vector<1x128xf32>
    %5 = vector.broadcast %4 : vector<1x128xf32> to vector<8x128xf32>
    %6 = arith.addf %3, %5 : vector<8x128xf32>
    %cst_5 = arith.constant 0.000000e+00 : f32
    %7 = vector.broadcast %cst_5 : f32 to vector<8x128xf32>
    %8 = arith.maximumf %6, %7 : vector<8x128xf32>
    %9 = arith.truncf %8 : vector<8x128xf32> to vector<8x128xbf16>
    %c0_6 = arith.constant 0 : index
    %c0_7 = arith.constant 0 : index
    %10 = vector.load %arg4[%c0_6, %c0_7] : memref<128x128xbf16, #tpu.memory_space<vmem>>, vector<128x128xbf16>
    %cst_8 = arith.constant dense<0.000000e+00> : vector<8x128xf32>
    %11 = tpu.matmul %9, %10, %cst_8 {dimension_numbers = #tpu.dot_dimension_numbers<[1], [0], [0], [1], [0, 0, 1, 1], [], []>} : vector<8x128xbf16>, vector<128x128xbf16>, vector<8x128xf32> -> vector<8x128xf32>
    %c0_9 = arith.constant 0 : index
    %c0_10 = arith.constant 0 : index
    %12 = vector.load %arg5[%c0_9, %c0_10] : memref<1x128xf32, #tpu.memory_space<vmem>>, vector<1x128xf32>
    %13 = vector.broadcast %12 : vector<1x128xf32> to vector<8x128xf32>
    %14 = arith.addf %11, %13 : vector<8x128xf32>
    %cst_11 = arith.constant 0.000000e+00 : f32
    %15 = vector.broadcast %cst_11 : f32 to vector<8x128xf32>
    %16 = arith.maximumf %14, %15 : vector<8x128xf32>
    %c0_12 = arith.constant 0 : index
    %c0_13 = arith.constant 0 : index
    %17 = vector.load %arg6[%c0_12, %c0_13] : memref<8x128xf32, #tpu.memory_space<vmem>>, vector<8x128xf32>
    tpu.vector_store %arg6[%c0_12, %c0_13], %16 {strides = array<i32>} : memref<8x128xf32, #tpu.memory_space<vmem>>, vector<8x128xf32>,
    return
  }
  func.func @transform_0(%arg0: i32) -> (i32, i32) {
    %c0_i32 = arith.constant 0 : i32
    %c0_i32_0 = arith.constant 0 : i32
    return %arg0, %c0_i32 : i32, i32
  }
  func.func @transform_1(%arg0: i32) -> (i32, i32) {
    %c0_i32 = arith.constant 0 : i32
    %c0_i32_0 = arith.constant 0 : i32
    %c0_i32_1 = arith.constant 0 : i32
    return %c0_i32, %c0_i32_0 : i32, i32
  }
  func.func @transform_2(%arg0: i32) -> (i32, i32) {
    %c0_i32 = arith.constant 0 : i32
    %c0_i32_0 = arith.constant 0 : i32
    %c0_i32_1 = arith.constant 0 : i32
    return %c0_i32, %c0_i32_0 : i32, i32
  }
  func.func @transform_3(%arg0: i32) -> (i32, i32) {
    %c0_i32 = arith.constant 0 : i32
    %c0_i32_0 = arith.constant 0 : i32
    %c0_i32_1 = arith.constant 0 : i32
    return %c0_i32, %c0_i32_0 : i32, i32
  }
  func.func @transform_4(%arg0: i32) -> (i32, i32) {
    %c0_i32 = arith.constant 0 : i32
    %c0_i32_0 = arith.constant 0 : i32
    %c0_i32_1 = arith.constant 0 : i32
    return %c0_i32, %c0_i32_0 : i32, i32
  }
  func.func @transform_5(%arg0: i32) -> (i32, i32) {
    %c0_i32 = arith.constant 0 : i32
    %c0_i32_0 = arith.constant 0 : i32
    return %arg0, %c0_i32 : i32, i32
  }
}

module attributes {stable_mosaic.version = 11 : i64} {
  func.func @_resident_w6_kernel(%arg0: i32, %arg1: memref<8x128xf32, #tpu.memory_space<vmem>>, %arg2: memref<128x128xbf16, #tpu.memory_space<vmem>>, %arg3: memref<1x128xf32, #tpu.memory_space<vmem>>, %arg4: memref<128x128xbf16, #tpu.memory_space<vmem>>, %arg5: memref<1x128xf32, #tpu.memory_space<vmem>>, %arg6: memref<8x128xf32, #tpu.memory_space<vmem>>) attributes {dimension_semantics = [#tpu.dimension_semantics<parallel>], iteration_bounds = array<i64: 1>, scalar_prefetch = 0 : i64, scratch_operands = 0 : i64, tpu.core_type = #tpu.core_type<tc>, window_params = [{transform_indices = @transform_0, window_bounds = array<i64: 8, 128>}, {pipeline_mode = #tpu.pipeline_mode<synchronous>, transform_indices = @transform_1, window_bounds = array<i64: 128, 128>}, {pipeline_mode = #tpu.pipeline_mode<synchronous>, transform_indices = @transform_2, window_bounds = array<i64: 1, 128>}, {pipeline_mode = #tpu.pipeline_mode<synchronous>, transform_indices = @transform_3, window_bounds = array<i64: 128, 128>}, {pipeline_mode = #tpu.pipeline_mode<synchronous>, transform_indices = @transform_4, window_bounds = array<i64: 1, 128>}, {transform_indices = @transform_5, window_bounds = array<i64: 8, 128>}]} {
    %c0 = arith.constant 0 : index
    %c0_0 = arith.constant 0 : index
    %0 = vector.load %arg1[%c0, %c0_0] : memref<8x128xf32, #tpu.memory_space<vmem>>, vector<8x128xf32>
    %1 = arith.truncf %0 : vector<8x128xf32> to vector<8x128xbf16>
    %c0_1 = arith.constant 0 : index
    %c0_2 = arith.constant 0 : index
    %2 = vector.load %arg2[%c0_1, %c0_2] : memref<128x128xbf16, #tpu.memory_space<vmem>>, vector<128x128xbf16>
    %cst = arith.constant dense<0.000000e+00> : vector<8x128xf32>
    %3 = tpu.matmul %1, %2, %cst {dimension_numbers = #tpu.dot_dimension_numbers<[1], [0], [0], [1], [0, 0, 1, 1], [], []>} : vector<8x128xbf16>, vector<128x128xbf16>, vector<8x128xf32> -> vector<8x128xf32>
    %c0_3 = arith.constant 0 : index
    %c0_4 = arith.constant 0 : index
    %4 = vector.load %arg3[%c0_3, %c0_4] : memref<1x128xf32, #tpu.memory_space<vmem>>, vector<1x128xf32>
    %5 = vector.broadcast %4 : vector<1x128xf32> to vector<8x128xf32>
    %6 = arith.addf %3, %5 : vector<8x128xf32>
    %cst_5 = arith.constant 0.000000e+00 : f32
    %7 = vector.broadcast %cst_5 : f32 to vector<8x128xf32>
    %8 = arith.maximumf %6, %7 : vector<8x128xf32>
    %9 = arith.truncf %8 : vector<8x128xf32> to vector<8x128xbf16>
    %c0_6 = arith.constant 0 : index
    %c0_7 = arith.constant 0 : index
    %10 = vector.load %arg4[%c0_6, %c0_7] : memref<128x128xbf16, #tpu.memory_space<vmem>>, vector<128x128xbf16>
    %cst_8 = arith.constant dense<0.000000e+00> : vector<8x128xf32>
    %11 = tpu.matmul %9, %10, %cst_8 {dimension_numbers = #tpu.dot_dimension_numbers<[1], [0], [0], [1], [0, 0, 1, 1], [], []>} : vector<8x128xbf16>, vector<128x128xbf16>, vector<8x128xf32> -> vector<8x128xf32>
    %c0_9 = arith.constant 0 : index
    %c0_10 = arith.constant 0 : index
    %12 = vector.load %arg5[%c0_9, %c0_10] : memref<1x128xf32, #tpu.memory_space<vmem>>, vector<1x128xf32>
    %13 = vector.broadcast %12 : vector<1x128xf32> to vector<8x128xf32>
    %14 = arith.addf %11, %13 : vector<8x128xf32>
    %cst_11 = arith.constant 0.000000e+00 : f32
    %15 = vector.broadcast %cst_11 : f32 to vector<8x128xf32>
    %16 = arith.maximumf %14, %15 : vector<8x128xf32>
    %c0_12 = arith.constant 0 : index
    %c0_13 = arith.constant 0 : index
    %17 = vector.load %arg6[%c0_12, %c0_13] : memref<8x128xf32, #tpu.memory_space<vmem>>, vector<8x128xf32>
    tpu.vector_store %arg6[%c0_12, %c0_13], %16 {strides = array<i32>} : memref<8x128xf32, #tpu.memory_space<vmem>>, vector<8x128xf32>,
    return
  }
  func.func @transform_0(%arg0: i32) -> (i32, i32) {
    %c0_i32 = arith.constant 0 : i32
    %c0_i32_0 = arith.constant 0 : i32
    return %arg0, %c0_i32 : i32, i32
  }
  func.func @transform_1(%arg0: i32) -> (i32, i32) {
    %c0_i32 = arith.constant 0 : i32
    %c0_i32_0 = arith.constant 0 : i32
    %c0_i32_1 = arith.constant 0 : i32
    return %c0_i32, %c0_i32_0 : i32, i32
  }
  func.func @transform_2(%arg0: i32) -> (i32, i32) {
    %c0_i32 = arith.constant 0 : i32
    %c0_i32_0 = arith.constant 0 : i32
    %c0_i32_1 = arith.constant 0 : i32
    return %c0_i32, %c0_i32_0 : i32, i32
  }
  func.func @transform_3(%arg0: i32) -> (i32, i32) {
    %c0_i32 = arith.constant 0 : i32
    %c0_i32_0 = arith.constant 0 : i32
    %c0_i32_1 = arith.constant 0 : i32
    return %c0_i32, %c0_i32_0 : i32, i32
  }
  func.func @transform_4(%arg0: i32) -> (i32, i32) {
    %c0_i32 = arith.constant 0 : i32
    %c0_i32_0 = arith.constant 0 : i32
    %c0_i32_1 = arith.constant 0 : i32
    return %c0_i32, %c0_i32_0 : i32, i32
  }
  func.func @transform_5(%arg0: i32) -> (i32, i32) {
    %c0_i32 = arith.constant 0 : i32
    %c0_i32_0 = arith.constant 0 : i32
    return %arg0, %c0_i32 : i32, i32
  }
}

</mosaic_0001>

<bundles_post_ra>
// kernel: tpu_custom_call.1
= control target key start
LH: loop header
LB: loop body
LE: loop exit
PB: predicated region body
PF: predicated region fallthrough
CT: control target
= control target key end

     0   :  { %10 = vsyncpa [#allocation3], 0  ;;  %s496_s0 = inlined_call_operand.hbm [shape: f32[8,128], index: 0, kind: input, shape index: {}]   ;;  %s497_s1 = inlined_call_operand.hbm [shape: bf16[128,128], index: 1, kind: input, shape index: {}]   ;;  %s498_s2 = inlined_call_operand.vmem [shape: f32[1,128], index: 2, kind: input, shape index: {}]   ;;  %s499_s3 = inlined_call_operand.hbm [shape: bf16[128,128], index: 3, kind: input, shape index: {}]   ;;  %s500_s4 = inlined_call_operand.vmem [shape: f32[1,128], index: 4, kind: input, shape index: {}]   ;;  %s501_s5 = inlined_call_operand.hbm [shape: f32[8,128], index: 5, kind: output, shape index: {}]  }
   0x1   :  { %11 = vsyncpa [#allocation6], 0  ;;  %s28_s20 = sshll.u32 %s497_s1, 4  ;;  %s29_s20 = int_to_ptr.hbm [resolvable:$true] %s28_s20 }
   0x2   :  { %12 = vsyncpa [#allocation4], 0  ;;  %s442_s21 = smov [#allocation5]   ;;  %s18_s25 = sshll.u32 %s496_s0, 4  ;;  %s19_s25 = int_to_ptr.hbm [resolvable:$true] %s18_s25 }
   0x3   :  { %s30_s22 = sshll.u32 %s442_s21, 4  ;;  %s443_s26 = smov 64   ;;  %s31_s22 = int_to_ptr.vmem [resolvable:$true] %s30_s22 }
   0x4   :  { %s444_s27 = smov 4   ;;  %s445_s28 = smov [#allocation2]  }
   0x5   :  { %36 = dma.hbm_to_vmem [thread:$0]  %s29_s20, 1024, %s31_s22, [#allocation6], %s443_s26, %s443_s26, %s444_s27  }
   0x6   :  { %s20_s29 = sshll.u32 %s445_s28, 4  ;;  %s43_s7 = sshll.u32 %s499_s3, 4  ;;  %s21_s29 = int_to_ptr.vmem [resolvable:$true] %s20_s29  ;;  %s44_s7 = int_to_ptr.hbm [resolvable:$true] %s43_s7 }
   0x7   :  { %23 = dma.hbm_to_vmem [thread:$0]  %s19_s25, 128, %s21_s29, [#allocation3]  }
   0x8   :  { %s446_s1 = smov [#allocation7]  }
   0x9   :  { %s45_s8 = sshll.u32 %s446_s1, 4  ;;  %s46_s8 = int_to_ptr.vmem [resolvable:$true] %s45_s8 }
   0xa   :  { %51 = dma.hbm_to_vmem [thread:$0]  %s44_s7, 1024, %s46_s8, [#allocation6], %s443_s26, %s443_s26, %s444_s27  }
   0xb   :  { %436 = dma.done.wait [#allocation3], 128  }
   0xc   :  { %437 = vsyncadd [#allocation3], 4294967168 }
   0xd   :  { %438 = dma.done.wait [#allocation6], 2048  }
   0xe   :  { %439 = vsyncadd [#allocation6], 4294965248  ;;  %v323_v0 = vld [vmem:[#allocation5 + $0x38] sm:$0xff]  ;;  %v322_v1 = vld [vmem:[#allocation5 + $0x30] sm:$0xff]  ;;  %s447_s11 = smov [#allocation8]   ;;  %s241_s15 = sshll.u32 %s501_s5, 4  ;;  %s242_s15 = int_to_ptr.hbm [resolvable:$true] %s241_s15 }
   0xf   :  { %136 = vmatpush.bf16.msra.mxu0 %v323_v0  ;;  %v331_v2 = vld [vmem:[#allocation7 + $0x38] sm:$0xff]  ;;  %v330_v3 = vld [vmem:[#allocation7 + $0x30] sm:$0xff]  ;;  %v321_v4 = vld [vmem:[#allocation5 + $0x28] sm:$0xff]  ;;  %s239_s12 = sshll.u32 %s447_s11, 4  ;;  %s240_s12 = int_to_ptr.vmem [resolvable:$true] %s239_s12 }
  0x10   :  { %219 = vmatpush.bf16.msra.mxu1 %v331_v2  ;;  %v329_v5 = vld [vmem:[#allocation7 + $0x28] sm:$0xff]  ;;  %v320_v6 = vld [vmem:[#allocation5 + $0x20] sm:$0xff]  ;;  %v319_v8 = vld [vmem:[#allocation5 + $0x18] sm:$0xff] }
  0x11   :  { %v328_v7 = vld [vmem:[#allocation7 + $0x20] sm:$0xff]  ;;  %v327_v9 = vld [vmem:[#allocation7 + $0x18] sm:$0xff]  ;;  %v318_v10 = vld [vmem:[#allocation5 + $0x10] sm:$0xff] }
  0x12   :  { %v326_v11 = vld [vmem:[#allocation7 + $0x10] sm:$0xff]  ;;  %v317_v12 = vld [vmem:[#allocation5 + $0x8] sm:$0xff]  ;;  %v316_v13 = vld [vmem:[#allocation5] sm:$0xff] }
  0x13   :  { %137 = vmatpush.bf16.msra.mxu0 %v322_v1  ;;  %v66_v14 = vld [vmem:[#allocation2] sm:$0xff]  ;;  %v325_v16 = vld [vmem:[#allocation7 + $0x8] sm:$0xff]  ;;  %v324_v17 = vld [vmem:[#allocation7] sm:$0xff] }
  0x14   :  { %220 = vmatpush.bf16.msra.mxu1 %v330_v3  ;;  %v67_v15 = vpack.c.bf16 %v66_v14, %v66_v14  ;;  %v338_v18 = vld [vmem:[%s498_s2] ss:$0 sm:$0xff] }
  0x15   :  { %v339_v24 = vld [vmem:[%s500_s4] ss:$0 sm:$0xff] }
  0x17   :  { %138 = vmatpush.bf16.msra.mxu0 %v321_v4 }
  0x18   :  { %221 = vmatpush.bf16.msra.mxu1 %v329_v5 }
  0x1b   :  { %139 = vmatpush.bf16.msra.mxu0 %v320_v6 }
  0x1c   :  { %222 = vmatpush.bf16.msra.mxu1 %v328_v7 }
  0x1f   :  { %140 = vmatpush.bf16.msra.mxu0 %v319_v8 }
  0x20   :  { %223 = vmatpush.bf16.msra.mxu1 %v327_v9 }
  0x23   :  { %141 = vmatpush.bf16.msra.mxu0 %v318_v10 }
  0x24   :  { %224 = vmatpush.bf16.msra.mxu1 %v326_v11 }
  0x27   :  { %142 = vmatpush.bf16.msra.mxu0 %v317_v12 }
  0x28   :  { %225 = vmatpush.bf16.msra.mxu1 %v325_v16 }
  0x2b   :  { %143 = vmatpush.bf16.msra.mxu0 %v316_v13 }
  0x2c   :  { %226 = vmatpush.bf16.msra.mxu1 %v324_v17 }
  0x2e   :  { %144 = vmatmul.bf16.vlgmr.msra.gmra.mxu0 %v67_v15 }
  0xab   :  { %v145_v19 = vpop.f32.mrf.mxu0 }
  0xac   :  { %v146_v20 = vadd.f32 %v338_v18, %v145_v19 }
  0xae   :  { %v149_v21 = vmax.f32 %v146_v20, 0.0 }
  0xb0   :  { %v150_v22 = vpack.c.bf16 %v149_v21, %v149_v21 }
  0xb2   :  { %227 = vmatmul.bf16.vlgmr.msra.gmra.mxu1 %v150_v22 }
  0xb3   :  { %v147_v23 = vpop.f32.mrf.mxu0 }
 0x12f   :  { %v228_v25 = vpop.f32.mrf.mxu1 }
 0x130   :  { %v229_v26 = vadd.f32 %v339_v24, %v228_v25 }
 0x132   :  { %v232_v27 = vmax.f32 %v229_v26, 0.0 }
 0x134   :  { %233 = vst [vmem:[#allocation8] sm:$0xff] %v232_v27 }
 0x135   :  { %244 = dma.vmem_to_hbm [thread:$0]  %s240_s12, 128, %s242_s15, [#allocation4]  }
 0x137   :  { %v230_v28 = vpop.f32.mrf.mxu1 }
 0x138   :  { %440 = dma.done.wait [#allocation4], 128  }
 0x139   :  { %441 = vsyncadd [#allocation4], 4294967168 }
 0x13a   :  { %249 = vsyncpa [#allocation3], 1 }
 0x13b   :  { %250 = vsyncpa [#allocation6], 1 }
 0x13c   :  { %251 = vsyncpa [#allocation4], 1 }

// kernel: tpu_custom_call.1
= control target key start
LH: loop header
LB: loop body
LE: loop exit
PB: predicated region body
PF: predicated region fallthrough
CT: control target
= control target key end

     0   :  { %10 = vsyncpa [#allocation3], 0  ;;  %s496_s0 = inlined_call_operand.hbm [shape: f32[8,128], index: 0, kind: input, shape index: {}]   ;;  %s497_s1 = inlined_call_operand.hbm [shape: bf16[128,128], index: 1, kind: input, shape index: {}]   ;;  %s498_s2 = inlined_call_operand.vmem [shape: f32[1,128], index: 2, kind: input, shape index: {}]   ;;  %s499_s3 = inlined_call_operand.hbm [shape: bf16[128,128], index: 3, kind: input, shape index: {}]   ;;  %s500_s4 = inlined_call_operand.vmem [shape: f32[1,128], index: 4, kind: input, shape index: {}]   ;;  %s501_s5 = inlined_call_operand.hbm [shape: f32[8,128], index: 5, kind: output, shape index: {}]  }
   0x1   :  { %11 = vsyncpa [#allocation6], 0  ;;  %s28_s20 = sshll.u32 %s497_s1, 4  ;;  %s29_s20 = int_to_ptr.hbm [resolvable:$true] %s28_s20 }
   0x2   :  { %12 = vsyncpa [#allocation4], 0  ;;  %s442_s21 = smov [#allocation5]   ;;  %s18_s25 = sshll.u32 %s496_s0, 4  ;;  %s19_s25 = int_to_ptr.hbm [resolvable:$true] %s18_s25 }
   0x3   :  { %s30_s22 = sshll.u32 %s442_s21, 4  ;;  %s443_s26 = smov 64   ;;  %s31_s22 = int_to_ptr.vmem [resolvable:$true] %s30_s22 }
   0x4   :  { %s444_s27 = smov 4   ;;  %s445_s28 = smov [#allocation2]  }
   0x5   :  { %36 = dma.hbm_to_vmem [thread:$0]  %s29_s20, 1024, %s31_s22, [#allocation6], %s443_s26, %s443_s26, %s444_s27  }
   0x6   :  { %s20_s29 = sshll.u32 %s445_s28, 4  ;;  %s43_s7 = sshll.u32 %s499_s3, 4  ;;  %s21_s29 = int_to_ptr.vmem [resolvable:$true] %s20_s29  ;;  %s44_s7 = int_to_ptr.hbm [resolvable:$true] %s43_s7 }
   0x7   :  { %23 = dma.hbm_to_vmem [thread:$0]  %s19_s25, 128, %s21_s29, [#allocation3]  }
   0x8   :  { %s446_s1 = smov [#allocation7]  }
   0x9   :  { %s45_s8 = sshll.u32 %s446_s1, 4  ;;  %s46_s8 = int_to_ptr.vmem [resolvable:$true] %s45_s8 }
   0xa   :  { %51 = dma.hbm_to_vmem [thread:$0]  %s44_s7, 1024, %s46_s8, [#allocation6], %s443_s26, %s443_s26, %s444_s27  }
   0xb   :  { %436 = dma.done.wait [#allocation3], 128  }
   0xc   :  { %437 = vsyncadd [#allocation3], 4294967168 }
   0xd   :  { %438 = dma.done.wait [#allocation6], 2048  }
   0xe   :  { %439 = vsyncadd [#allocation6], 4294965248  ;;  %v323_v0 = vld [vmem:[#allocation5 + $0x38] sm:$0xff]  ;;  %v322_v1 = vld [vmem:[#allocation5 + $0x30] sm:$0xff]  ;;  %s447_s11 = smov [#allocation8]   ;;  %s241_s15 = sshll.u32 %s501_s5, 4  ;;  %s242_s15 = int_to_ptr.hbm [resolvable:$true] %s241_s15 }
   0xf   :  { %136 = vmatpush.bf16.msra.mxu0 %v323_v0  ;;  %v331_v2 = vld [vmem:[#allocation7 + $0x38] sm:$0xff]  ;;  %v330_v3 = vld [vmem:[#allocation7 + $0x30] sm:$0xff]  ;;  %v321_v4 = vld [vmem:[#allocation5 + $0x28] sm:$0xff]  ;;  %s239_s12 = sshll.u32 %s447_s11, 4  ;;  %s240_s12 = int_to_ptr.vmem [resolvable:$true] %s239_s12 }
  0x10   :  { %219 = vmatpush.bf16.msra.mxu1 %v331_v2  ;;  %v329_v5 = vld [vmem:[#allocation7 + $0x28] sm:$0xff]  ;;  %v320_v6 = vld [vmem:[#allocation5 + $0x20] sm:$0xff]  ;;  %v319_v8 = vld [vmem:[#allocation5 + $0x18] sm:$0xff] }
  0x11   :  { %v328_v7 = vld [vmem:[#allocation7 + $0x20] sm:$0xff]  ;;  %v327_v9 = vld [vmem:[#allocation7 + $0x18] sm:$0xff]  ;;  %v318_v10 = vld [vmem:[#allocation5 + $0x10] sm:$0xff] }
  0x12   :  { %v326_v11 = vld [vmem:[#allocation7 + $0x10] sm:$0xff]  ;;  %v317_v12 = vld [vmem:[#allocation5 + $0x8] sm:$0xff]  ;;  %v316_v13 = vld [vmem:[#allocation5] sm:$0xff] }
  0x13   :  { %137 = vmatpush.bf16.msra.mxu0 %v322_v1  ;;  %v66_v14 = vld [vmem:[#allocation2] sm:$0xff]  ;;  %v325_v16 = vld [vmem:[#allocation7 + $0x8] sm:$0xff]  ;;  %v324_v17 = vld [vmem:[#allocation7] sm:$0xff] }
  0x14   :  { %220 = vmatpush.bf16.msra.mxu1 %v330_v3  ;;  %v67_v15 = vpack.c.bf16 %v66_v14, %v66_v14  ;;  %v338_v18 = vld [vmem:[%s498_s2] ss:$0 sm:$0xff] }
  0x15   :  { %v339_v24 = vld [vmem:[%s500_s4] ss:$0 sm:$0xff] }
  0x17   :  { %138 = vmatpush.bf16.msra.mxu0 %v321_v4 }
  0x18   :  { %221 = vmatpush.bf16.msra.mxu1 %v329_v5 }
  0x1b   :  { %139 = vmatpush.bf16.msra.mxu0 %v320_v6 }
  0x1c   :  { %222 = vmatpush.bf16.msra.mxu1 %v328_v7 }
  0x1f   :  { %140 = vmatpush.bf16.msra.mxu0 %v319_v8 }
  0x20   :  { %223 = vmatpush.bf16.msra.mxu1 %v327_v9 }
  0x23   :  { %141 = vmatpush.bf16.msra.mxu0 %v318_v10 }
  0x24   :  { %224 = vmatpush.bf16.msra.mxu1 %v326_v11 }
  0x27   :  { %142 = vmatpush.bf16.msra.mxu0 %v317_v12 }
  0x28   :  { %225 = vmatpush.bf16.msra.mxu1 %v325_v16 }
  0x2b   :  { %143 = vmatpush.bf16.msra.mxu0 %v316_v13 }
  0x2c   :  { %226 = vmatpush.bf16.msra.mxu1 %v324_v17 }
  0x2e   :  { %144 = vmatmul.bf16.vlgmr.msra.gmra.mxu0 %v67_v15 }
  0xab   :  { %v145_v19 = vpop.f32.mrf.mxu0 }
  0xac   :  { %v146_v20 = vadd.f32 %v338_v18, %v145_v19 }
  0xae   :  { %v149_v21 = vmax.f32 %v146_v20, 0.0 }
  0xb0   :  { %v150_v22 = vpack.c.bf16 %v149_v21, %v149_v21 }
  0xb2   :  { %227 = vmatmul.bf16.vlgmr.msra.gmra.mxu1 %v150_v22 }
  0xb3   :  { %v147_v23 = vpop.f32.mrf.mxu0 }
 0x12f   :  { %v228_v25 = vpop.f32.mrf.mxu1 }
 0x130   :  { %v229_v26 = vadd.f32 %v339_v24, %v228_v25 }
 0x132   :  { %v232_v27 = vmax.f32 %v229_v26, 0.0 }
 0x134   :  { %233 = vst [vmem:[#allocation8] sm:$0xff] %v232_v27 }
 0x135   :  { %244 = dma.vmem_to_hbm [thread:$0]  %s240_s12, 128, %s242_s15, [#allocation4]  }
 0x137   :  { %v230_v28 = vpop.f32.mrf.mxu1 }
 0x138   :  { %440 = dma.done.wait [#allocation4], 128  }
 0x139   :  { %441 = vsyncadd [#allocation4], 4294967168 }
 0x13a   :  { %249 = vsyncpa [#allocation3], 1 }
 0x13b   :  { %250 = vsyncpa [#allocation6], 1 }
 0x13c   :  { %251 = vsyncpa [#allocation4], 1 }

</bundles_post_ra>
